<compile_context>
chip_gen: v6e
topology: v6e:2x2x1
jax: 0.10.0
libtpu: 0.0.40
codegen_flags: <defaults>
</compile_context>

<pallas_src>
import functools

import jax
import jax.numpy as jnp
from jax.experimental import pallas as pl
from jax.experimental.pallas import tpu as pltpu

_LANE = 128
_MIB = 1024 * 1024


def _cdiv(a, b):
    return -(-a // b)


def _vmem_limits():
    """(vmem_limit_bytes, planning budget) derived from the chip generation."""
    try:
        phys = int(pltpu.get_tpu_info().vmem_capacity_bytes)
    except Exception:
        phys = 64 * _MIB  # conservative fallback = v7x per-TC VMEM
    # ~96 MiB limit on v5e/v6e (128 MiB physical), ~48 MiB on v7x (64 MiB).
    limit = min(3 * phys // 4, phys - 8 * _MIB)
    budget = max(limit - 8 * _MIB, limit // 2)  # headroom for compiler scratch
    return limit, budget


def _num_k_splits():
    """2 on v7x (2 TensorCores per chip), 1 on single-TC generations."""
    try:
        kind = jax.devices()[0].device_kind.lower()
    except Exception:
        return 1
    return 2 if ("v7" in kind or "7x" in kind) else 1


def _choose_k_tile(n, k, itemsize, resident_bytes, budget_bytes, num_splits):
    """Pick the lane-aligned K tile.

    As large as the VMEM budget allows (double-buffered (n, tk) feature
    stream on top of the resident output blocks), but capped so the K grid
    keeps >= ~4 pipelined steps per core (DMA/compute overlap), with a
    ~512-column floor so per-step overhead stays amortized.
    """
    k_lanes = _cdiv(k, _LANE)
    per_lane = 2 * n * itemsize * _LANE  # double-buffered stream per 128 cols
    avail = max(budget_bytes - resident_bytes, per_lane)
    vmem_lanes = max(avail // per_lane, 1)
    min_steps = 4 * num_splits
    depth_lanes = max(_cdiv(k_lanes, min_steps), 4)  # floor: 4*128 = 512 cols
    tk_lanes = max(min(vmem_lanes, depth_lanes, k_lanes), 1)
    return tk_lanes * _LANE


# ---------------------------------------------------------------------------
# Kernel
# ---------------------------------------------------------------------------
def _gram_kernel(inv_div, tk, k, steps_per_core, needs_mask, feat_ref, g_ref):
    """Accumulate feat @ feat.T into this core's resident output block."""
    core = pl.program_id(0)
    step = pl.program_id(1)

    @pl.when(step == 0)
    def _():
        g_ref[...] = jnp.zeros_like(g_ref)

    f = feat_ref[...]  # (n, tk), input dtype
    if needs_mask:
        # Zero columns past the logical end of K (ragged last tile and any
        # clamped out-of-range steps from the per-core split).
        col_start = (core * steps_per_core + step) * tk
        col_ids = jax.lax.broadcasted_iota(jnp.int32, f.shape, 1)
        f = jnp.where(col_ids < (k - col_start), f, jnp.zeros_like(f))

    # Transposed-B contraction: the MXU consumes it directly, no XLU
    # transpose/relayout of the (n, tk) tile; accumulation forced to f32.
    g_ref[0, :, :] += jax.lax.dot_general(
        f, f, (((1,), (1,)), ((), ())), preferred_element_type=jnp.float32)

    @pl.when(step == pl.num_programs(1) - 1)
    def _():
        g_ref[...] *= inv_div


# ---------------------------------------------------------------------------
# Wrappers
# ---------------------------------------------------------------------------
def _prep_features(x, stream_dtype=None):
    b, c, h, w = x.shape
    n, k = b * c, h * w
    feats = x.reshape(n, k)
    if stream_dtype is not None:
        # Opt-in reduced-precision streaming (e.g. bf16): halves HBM bytes;
        # accumulation stays f32 via preferred_element_type in the kernel.
        feats = feats.astype(stream_dtype)
    return feats, n, k, 1.0 / float(b * c * h * w)


def gram_matrix_pallas(x, stream_dtype=None):
    """x: (B, C, H, W) -> (B*C, B*C) gram matrix / (B*C*H*W), float32."""
    feats, n, k, inv_div = _prep_features(x, stream_dtype)
    itemsize = feats.dtype.itemsize
    limit, budget = _vmem_limits()
    num_splits = _num_k_splits()

    # Resident VMEM: double-buffered (1, n, n) f32 output block.
    resident = 2 * n * n * 4
    if resident + 2 * n * _LANE * itemsize > budget:
        # TODO(synk): tile the N (=B*C) axis once resident gram blocks outgrow VMEM.
        raise ValueError(
            f"gram_matrix_pallas: B*C={n} too large for resident ({n},{n}) f32 "
            f"gram blocks within the {budget // _MIB} MiB VMEM budget.")

    tk = _choose_k_tile(n, k, itemsize, resident, budget, num_splits)
    total_steps = _cdiv(k, tk)
    if total_steps < num_splits:
        num_splits = 1
    steps_per_core = _cdiv(total_steps, num_splits)
    padded_steps = steps_per_core * num_splits
    needs_mask = (k % tk != 0) or (padded_steps != total_steps)
    last_step = total_steps - 1

    if padded_steps == total_steps:
        feat_map = lambda c, i: (0, c * steps_per_core + i)
    else:
        # Clamp logically-out-of-range steps onto the last valid tile; the
        # in-kernel column mask zeroes their contribution.
        feat_map = lambda c, i: (0, jnp.minimum(c * steps_per_core + i, last_step))

    kernel = functools.partial(
        _gram_kernel, inv_div, tk, k, steps_per_core, needs_mask)

    partials = pl.pallas_call(
        kernel,
        out_shape=jax.ShapeDtypeStruct((num_splits, n, n), jnp.float32),
        grid_spec=pltpu.PrefetchScalarGridSpec(
            num_scalar_prefetch=0,
            grid=(num_splits, steps_per_core),
            in_specs=[pl.BlockSpec((n, tk), feat_map)],
            out_specs=pl.BlockSpec((1, n, n), lambda c, i: (c, 0, 0)),
        ),
        compiler_params=pltpu.CompilerParams(
            dimension_semantics=("parallel", "arbitrary"),
            vmem_limit_bytes=limit,
        ),
    )(feats)

    if num_splits == 1:
        return partials[0]
    # Per-core partials are already scaled by inv_div (linear), so summing is exact.
    return partials.sum(axis=0)


def style_loss_pallas(x, target_gram, stream_dtype=None):
    """MSE(gram(x), target_gram). Gram on the MXU, tiny (N,N) MSE in plain JAX."""
    g = gram_matrix_pallas(x, stream_dtype)
    diff = g - target_gram.astype(jnp.float32)
    return jnp.mean(diff * diff)


class StyleLoss:
    """JAX/Pallas port of the PyTorch StyleLoss module.

    __call__(x) returns `x` unchanged (identity pass-through) and stores the
    MSE between gram_matrix(x) and the pre-computed target gram in self.loss,
    exactly like the PyTorch module. `stream_dtype=jnp.bfloat16` is an opt-in
    perf mode (changes numerics slightly vs. the f32 reference).
    """

    def __init__(self, target_feature, stream_dtype=None):
        self.stream_dtype = stream_dtype
        self.target = jax.lax.stop_gradient(
            gram_matrix_pallas(target_feature, stream_dtype))
        self.loss = None

    def __call__(self, x):
        self.loss = style_loss_pallas(x, self.target, self.stream_dtype)
        return x


# ---------------------------------------------------------------------------
# Demo / self-check
# ---------------------------------------------------------------------------
def _gram_ref(x):
    b, c, h, w = x.shape
    f = x.reshape(b * c, h * w).astype(jnp.float32)
    return (f @ f.T) / float(b * c * h * w)


if __name__ == "__main__":
    key = jax.random.PRNGKey(0)
    k_t, k_x, k_r = jax.random.split(key, 3)

    # Small shapes consistent with a conv feature map: (B, C, H, W)
    target_feature = jax.random.normal(k_t, (2, 4, 16, 16), dtype=jnp.float32)
    x = jax.random.normal(k_x, (2, 4, 16, 16), dtype=jnp.float32)

    module = StyleLoss(target_feature)
    out = jax.block_until_ready(module(x))
    loss = jax.block_until_ready(module.loss)

    # Reference check (plain JAX)
    g_ref = _gram_ref(x)
    t_ref = _gram_ref(target_feature)
    loss_ref = jnp.mean((g_ref - t_ref) ** 2)

    assert out.shape == x.shape and jnp.allclose(out, x)
    assert jnp.allclose(loss, loss_ref, rtol=1e-5, atol=1e-6), (loss, loss_ref)

    # Ragged K (H*W = 676, not a multiple of 128) exercises the in-kernel
    # column mask instead of the old jnp.pad path.
    x_r = jax.random.normal(k_r, (1, 8, 26, 26), dtype=jnp.float32)
    g_r = jax.block_until_ready(gram_matrix_pallas(x_r))
    assert jnp.allclose(g_r, _gram_ref(x_r), rtol=1e-5, atol=1e-6)

    print("KERNEL_OK")
</pallas_src>

<mosaic_0001>
module attributes {stable_mosaic.version = 11 : i64} {
  func.func @_gram_kernel(%arg0: i32, %arg1: i32, %arg2: memref<8x256xf32, #tpu.memory_space<vmem>>, %arg3: memref<1x8x8xf32, #tpu.memory_space<vmem>>) attributes {dimension_semantics = [#tpu.dimension_semantics<parallel>, #tpu.dimension_semantics<arbitrary>], iteration_bounds = array<i64: 1, 1>, scalar_prefetch = 0 : i64, scratch_operands = 0 : i64, tpu.core_type = #tpu.core_type<tc>, window_params = [{transform_indices = @transform_0, window_bounds = array<i64: 8, 256>}, {transform_indices = @transform_1, window_bounds = array<i64: 1, 8, 8>}]} {
    %c0_i32 = arith.constant 0 : i32
    %0 = arith.cmpi eq, %arg1, %c0_i32 : i32
    %1 = arith.extui %0 : i1 to i32
    %c0_i32_0 = arith.constant 0 : i32
    %2 = arith.cmpi ne, %1, %c0_i32_0 : i32
    scf.if %2 {
      %cst_10 = arith.constant 0.000000e+00 : f32
      %14 = vector.broadcast %cst_10 : f32 to vector<1x8x8xf32>
      %c0_11 = arith.constant 0 : index
      %c0_12 = arith.constant 0 : index
      %c0_13 = arith.constant 0 : index
      %15 = vector.load %arg3[%c0_11, %c0_12, %c0_13] : memref<1x8x8xf32, #tpu.memory_space<vmem>>, vector<1x8x8xf32>
      tpu.vector_store %arg3[%c0_11, %c0_12, %c0_13], %14 {strides = array<i32>} : memref<1x8x8xf32, #tpu.memory_space<vmem>>, vector<1x8x8xf32>,
    } else {
    }
    %c0 = arith.constant 0 : index
    %c0_1 = arith.constant 0 : index
    %3 = vector.load %arg2[%c0, %c0_1] : memref<8x256xf32, #tpu.memory_space<vmem>>, vector<8x256xf32>
    %c0_2 = arith.constant 0 : index
    %c0_3 = arith.constant 0 : index
    %c0_4 = arith.constant 0 : index
    %4 = vector.load %arg3[%c0_2, %c0_3, %c0_4] : memref<1x8x8xf32, #tpu.memory_space<vmem>>, vector<1x8x8xf32>
    %5 = vector.shape_cast %4 : vector<1x8x8xf32> to vector<8x8xf32>
    %cst = arith.constant dense<0.000000e+00> : vector<8x8xf32>
    %6 = tpu.matmul %3, %3, %cst {dimension_numbers = #tpu.dot_dimension_numbers<[1], [1], [0], [0], [0, 0, 1, 0], [], []>} : vector<8x256xf32>, vector<8x256xf32>, vector<8x8xf32> -> vector<8x8xf32>
    %7 = arith.addf %5, %6 : vector<8x8xf32>
    %c0_5 = arith.constant 0 : index
    %c0_6 = arith.constant 0 : index
    %c0_7 = arith.constant 0 : index
    %8 = vector.load %arg3[%c0_5, %c0_6, %c0_7] : memref<1x8x8xf32, #tpu.memory_space<vmem>>, vector<1x8x8xf32>
    %9 = vector.shape_cast %8 : vector<1x8x8xf32> to vector<8x8xf32>
    %10 = vector.shape_cast %7 : vector<8x8xf32> to vector<1x8x8xf32>
    tpu.vector_store %arg3[%c0_5, %c0_6, %c0_7], %10 {strides = array<i32>} : memref<1x8x8xf32, #tpu.memory_space<vmem>>, vector<1x8x8xf32>,
    %c0_i32_8 = arith.constant 0 : i32
    %11 = arith.cmpi eq, %arg1, %c0_i32_8 : i32
    %12 = arith.extui %11 : i1 to i32
    %c0_i32_9 = arith.constant 0 : i32
    %13 = arith.cmpi ne, %12, %c0_i32_9 : i32
    scf.if %13 {
      %c0_10 = arith.constant 0 : index
      %c0_11 = arith.constant 0 : index
      %c0_12 = arith.constant 0 : index
      %14 = vector.load %arg3[%c0_10, %c0_11, %c0_12] : memref<1x8x8xf32, #tpu.memory_space<vmem>>, vector<1x8x8xf32>
      %cst_13 = arith.constant 4.8828125E-4 : f32
      %15 = vector.broadcast %cst_13 : f32 to vector<1x8x8xf32>
      %16 = arith.mulf %14, %15 : vector<1x8x8xf32>
      %c0_14 = arith.constant 0 : index
      %c0_15 = arith.constant 0 : index
      %c0_16 = arith.constant 0 : index
      %17 = vector.load %arg3[%c0_14, %c0_15, %c0_16] : memref<1x8x8xf32, #tpu.memory_space<vmem>>, vector<1x8x8xf32>
      tpu.vector_store %arg3[%c0_14, %c0_15, %c0_16], %16 {strides = array<i32>} : memref<1x8x8xf32, #tpu.memory_space<vmem>>, vector<1x8x8xf32>,
    } else {
    }
    return
  }
  func.func @transform_0(%arg0: i32, %arg1: i32) -> (i32, i32) {
    %c1_i32 = arith.constant 1 : i32
    %0 = arith.muli %arg0, %c1_i32 : i32
    %1 = arith.addi %0, %arg1 : i32
    %c0_i32 = arith.constant 0 : i32
    %c0_i32_0 = arith.constant 0 : i32
    return %c0_i32, %1 : i32, i32
  }
  func.func @transform_1(%arg0: i32, %arg1: i32) -> (i32, i32, i32) {
    %c0_i32 = arith.constant 0 : i32
    %c0_i32_0 = arith.constant 0 : i32
    %c0_i32_1 = arith.constant 0 : i32
    return %arg0, %c0_i32, %c0_i32_0 : i32, i32, i32
  }
}

</mosaic_0001>

<bundles_post_ra>
// kernel: tpu_custom_call.1
= control target key start
LH: loop header
LB: loop body
LE: loop exit
PB: predicated region body
PF: predicated region fallthrough
CT: control target
= control target key end

     0   :  { %6 = vsyncpa [#allocation3], 0  ;;  %s199_s0 = inlined_call_operand.hbm [shape: f32[8,256], index: 0, kind: input, shape index: {}]   ;;  %s200_s1 = inlined_call_operand.hbm [shape: f32[1,8,8], index: 1, kind: output, shape index: {}]  }
   0x1   :  { %7 = vsyncpa [#allocation4], 0  ;;  %s177_s6 = smov [#allocation2]  }
   0x2   :  { %s18_s7 = sshll.u32 %s177_s6, 4  ;;  %s19_s7 = int_to_ptr.vmem [resolvable:$true] %s18_s7 }
   0x3   :  { %s141_s8 = scalar_lea.vmem %s19_s7, 256  ;;  %p146_p1 = scmp.lt.s32.totalorder %s19_s7, %s19_s7 }
   0x4   :  { %p142_p0 = scmp.ne.s32.totalorder %s19_s7, %s141_s8  ;;  %p147_p2 = scmp.lt.s32.totalorder %s141_s8, %s141_s8 }
   0x6   :  { %p148_p3 = por %p147_p2, %p146_p1 }
   0x8   :  { %p149_p4 = pnand %p148_p3, %p142_p0 }
   0xa   :  { %152 = shalt.err (!%p149_p4)
}
   0xb   :  { %21 = dma.hbm_to_vmem [thread:$0]  %s199_s0, 256, %s19_s7, [#allocation3]  }
   0xc   :  { %173 = dma.done.wait [#allocation3], 256  }
   0xd   :  { %174 = vsyncadd [#allocation3], 4294967040  ;;  %vm31_vm0 = vcmask 64512   ;;  %v178_v0 = vmov 0.0   ;;  %v34_v1 = vld [vmem:[#allocation2 + $0x8] sm:$0xff]  ;;  %v33_v2 = vld [vmem:[#allocation2] sm:$0xff] }
   0xe   :  { %32 = vst.msk [vmem:[#allocation5] sm:$0xff] %vm31_vm0, %v178_v0  ;;  %66 = vmatprep.subr.mxu0 %v34_v1  ;;  %100 = vmatprep.mubr.f32.mxu0 %v34_v1  ;;  %s179_s11 = smov [#allocation5]  }
   0xf   :  { %67 = vmatpush1.xpose.msra.mxu0 %v33_v2  ;;  %s121_s0 = sshll.u32 %s179_s11, 4  ;;  %s122_s0 = int_to_ptr.vmem [resolvable:$true] %s121_s0 }
  0x10   :  { %s153_s12 = scalar_lea.vmem %s122_s0, 128  ;;  %p158_p6 = scmp.lt.s32.totalorder %s122_s0, %s122_s0 }
  0x11   :  { %p154_p5 = scmp.ne.s32.totalorder %s122_s0, %s153_s12  ;;  %p159_p7 = scmp.lt.s32.totalorder %s153_s12, %s153_s12 }
  0x12   :  { %101 = vmatmul.mubr.f32.vlgmr.msra.gmra.mxu0 %v33_v2 }
  0x13   :  { %p160_p8 = por %p159_p7, %p158_p6 }
  0x15   :  { %v35_v3 = vld [vmem:[#allocation5] sm:$0xff]  ;;  %p161_p9 = pnand %p160_p8, %p154_p5 }
  0xd2   :  { %v102_v4 = vpop.f32.mrf.mxu0 }
  0xd3   :  { %v106_v5 = vadd.f32 %v102_v4, %v35_v3 }
  0xd4   :  { %v104_v6 = vpop.f32.mrf.mxu0 }
  0xd5   :  { %108 = vst.msk [vmem:[#allocation5] sm:$0xff] %vm31_vm0, %v106_v5 }
  0xdc   :  { %v112_v7 = vld [vmem:[#allocation5] sm:$0xff] }
  0xdd   :  { %v113_v8 = vmul.f32 0.00048828125, %v112_v7 }
  0xdf   :  { %114 = vst.msk [vmem:[#allocation5] sm:$0xff] %vm31_vm0, %v113_v8 }
  0xe0   :  { %164 = shalt.err (!%p161_p9)
}
  0xe1   :  { %124 = dma.vmem_to_hbm [thread:$0]  %s122_s0, 128, %s200_s1, [#allocation4]  }
  0xe2   :  { %175 = dma.done.wait [#allocation4], 128  }
  0xe3   :  { %176 = vsyncadd [#allocation4], 4294967168 }
  0xe4   :  { %128 = vsyncpa [#allocation3], 1 }
  0xe5   :  { %129 = vsyncpa [#allocation4], 1 }

</bundles_post_ra>
